<compile_context>
chip_gen: v7x
topology: tpu7x:2x2x1
jax: 0.10.0
libtpu: 0.0.40
codegen_flags: <defaults>
</compile_context>

<pallas_src>
import math

import jax
import jax.numpy as jnp
from jax import lax
from jax.experimental import pallas as pl
from jax.experimental.pallas import tpu as pltpu

# 32 MiB scoped VMEM: above v5e's 16 MiB default, comfortably inside v7x's
# 64 MiB physical VMEM, and ample for the <=512-wide tiles used below
# (attention footprint ~5 MiB, matmul ~6 MiB at 512^2 bf16 blocks).
_VMEM_LIMIT = 32 * 1024 * 1024
_NEG_BIG = -1e30                 # finite "-inf": NaN-safe under online softmax


def _pick_tile(dim, base, target):
    """Largest tile <= target that is a multiple of `base` and divides `dim`;
    falls back to the full dim (always a legal block)."""
    if dim <= target:
        return dim
    if dim % base != 0:
        return dim
    t = target - (target % base)
    while t >= base:
        if dim % t == 0:
            return t
        t -= base
    return dim


# ---------------------------------------------------------------------------
# Tiled matmul kernel (projections): bf16 operands, f32 accumulation
# ---------------------------------------------------------------------------

def _matmul_kernel(x_ref, w_ref, o_ref, acc_ref):
    @pl.when(pl.program_id(2) == 0)
    def _init():
        acc_ref[...] = jnp.zeros(acc_ref.shape, acc_ref.dtype)

    acc_ref[...] += jnp.dot(x_ref[...], w_ref[...],
                            preferred_element_type=jnp.float32)

    @pl.when(pl.program_id(2) == pl.num_programs(2) - 1)
    def _finalize():
        o_ref[...] = acc_ref[...].astype(o_ref.dtype)


def pallas_matmul(x, w, *, out_dtype=None, target_m=512, target_n=512,
                  target_k=512):
    """x: [M, K], w: [K, N] -> [M, N].  Callers pass bf16 operands; accumulation
    is always f32 in VMEM scratch, cast to out_dtype on finalize."""
    M, K = x.shape
    K2, N = w.shape
    assert K == K2
    out_dtype = x.dtype if out_dtype is None else out_dtype
    tm = _pick_tile(M, 8, target_m)
    tk = _pick_tile(K, 128, target_k)
    tn = _pick_tile(N, 128, target_n)
    grid = (M // tm, N // tn, K // tk)
    return pl.pallas_call(
        _matmul_kernel,
        out_shape=jax.ShapeDtypeStruct((M, N), out_dtype),
        grid_spec=pltpu.PrefetchScalarGridSpec(
            num_scalar_prefetch=0,
            grid=grid,
            in_specs=[
                pl.BlockSpec((tm, tk), lambda i, j, k: (i, k)),
                pl.BlockSpec((tk, tn), lambda i, j, k: (k, j)),
            ],
            out_specs=pl.BlockSpec((tm, tn), lambda i, j, k: (i, j)),
            scratch_shapes=[pltpu.VMEM((tm, tn), jnp.float32)],
        ),
        compiler_params=pltpu.CompilerParams(
            dimension_semantics=("parallel", "parallel", "arbitrary"),
            vmem_limit_bytes=_VMEM_LIMIT,
        ),
    )(x, w)


# ---------------------------------------------------------------------------
# RoPE + split pass: fused qkv [B,S,3D] -> rotated q, rotated k, v  (bf16)
# ---------------------------------------------------------------------------

def _rope_split_kernel(qkv_ref, cos_ref, sin_ref, q_ref, k_ref, v_ref):
    # qkv_ref: (ts, 3D); cos/sin: (ts, Dh); q/k/v out: (ts, D)
    D = q_ref.shape[-1]
    Dh = cos_ref.shape[-1]
    H = D // Dh
    half = Dh // 2
    scale = 1.0 / math.sqrt(Dh)

    cos = cos_ref[...]
    sin = sin_ref[...]          # pre-signed: encodes rotate_half's -/+ pattern

    # v passes through untouched (already contiguous lane-aligned slice).
    v_ref[...] = qkv_ref[:, 2 * D:3 * D].astype(v_ref.dtype)

    # H=4 here: full unroll is fine.  For H >= 16 switch to lax.fori_loop with
    # pl.ds slices to bound code size / vreg pressure.
    for h in range(H):
        sl = slice(h * Dh, (h + 1) * Dh)
        qh = qkv_ref[:, sl].astype(jnp.float32)
        kh = qkv_ref[:, D + h * Dh:D + (h + 1) * Dh].astype(jnp.float32)
        # rotate_half(x)*sin == roll(x, Dh/2)*sin_signed ; fold 1/sqrt(Dh) into q
        q_ref[:, sl] = ((qh * cos + pltpu.roll(qh, half, axis=1) * sin)
                        * scale).astype(q_ref.dtype)
        k_ref[:, sl] = (kh * cos
                        + pltpu.roll(kh, half, axis=1) * sin).astype(k_ref.dtype)


def rope_split(qkv, cos, sin_signed, n_head, *, block_s=None):
    """qkv: [B,S,3D]; cos/sin_signed: [S,Dh] -> (q_rot_scaled, k_rot, v), bf16."""
    B, S, threeD = qkv.shape
    D = threeD // 3
    Dh = D // n_head
    ts = block_s if block_s is not None else _pick_tile(S, 8, 512)
    assert S % ts == 0
    grid = (B, S // ts)

    qkv_spec = pl.BlockSpec((None, ts, threeD), lambda b, i: (b, i, 0))
    tab_spec = pl.BlockSpec((ts, Dh), lambda b, i: (i, 0))
    out_spec = pl.BlockSpec((None, ts, D), lambda b, i: (b, i, 0))
    out_shape = tuple(jax.ShapeDtypeStruct((B, S, D), jnp.bfloat16)
                      for _ in range(3))
    return pl.pallas_call(
        _rope_split_kernel,
        out_shape=out_shape,
        grid_spec=pltpu.PrefetchScalarGridSpec(
            num_scalar_prefetch=0,
            grid=grid,
            in_specs=[qkv_spec, tab_spec, tab_spec],
            out_specs=[out_spec, out_spec, out_spec],
        ),
        compiler_params=pltpu.CompilerParams(
            dimension_semantics=("parallel", "parallel"),
            vmem_limit_bytes=_VMEM_LIMIT,
        ),
    )(qkv, cos, sin_signed)


# ---------------------------------------------------------------------------
# Flash attention kernel (causal online-softmax), all heads per grid step
# ---------------------------------------------------------------------------

def _flash_attn_kernel(q_ref, k_ref, v_ref, o_ref, acc_ref, m_ref, l_ref):
    # q_ref: (tq, D) bf16 (already rotated + pre-scaled by 1/sqrt(Dh))
    # k_ref/v_ref: (tk, D) bf16 (k already rotated)
    # acc_ref: (tq, D) f32 ; m_ref/l_ref: (H, tq, 1) f32
    tq, D = q_ref.shape
    tk = k_ref.shape[0]
    H = m_ref.shape[0]
    Dh = D // H

    qi = pl.program_id(1)
    ki = pl.program_id(2)
    num_kv = pl.num_programs(2)

    q_start = qi * tq
    q_end = q_start + tq - 1
    k_start = ki * tk
    k_end = k_start + tk - 1

    @pl.when(ki == 0)
    def _init():
        m_ref[...] = jnp.full(m_ref.shape, _NEG_BIG, m_ref.dtype)
        l_ref[...] = jnp.zeros(l_ref.shape, l_ref.dtype)
        acc_ref[...] = jnp.zeros(acc_ref.shape, acc_ref.dtype)

    def update(masked):
        if masked:
            row = q_start + lax.broadcasted_iota(jnp.int32, (tq, tk), 0)
            col = k_start + lax.broadcasted_iota(jnp.int32, (tq, tk), 1)
            bias = jnp.where(col <= row, 0.0, _NEG_BIG).astype(jnp.float32)
        # H=4: full unroll is fine (see note in _rope_split_kernel for large H).
        for h in range(H):
            sl = slice(h * Dh, (h + 1) * Dh)
            qh = q_ref[:, sl]                               # bf16, pre-scaled
            kh = k_ref[:, sl]                               # bf16, pre-rotated
            # scores = q k^T : bf16 operands, f32 accumulation (MXU rate)
            s = lax.dot_general(qh, kh, (((1,), (1,)), ((), ())),
                                preferred_element_type=jnp.float32)  # (tq, tk)
            if masked:
                s = s + bias

            m_prev = m_ref[h]                               # (tq, 1) f32
            m_cur = jnp.max(s, axis=-1, keepdims=True)
            m_new = jnp.maximum(m_prev, m_cur)
            alpha = jnp.exp(m_prev - m_new)
            p = jnp.exp(s - m_new)                          # (tq, tk) f32

            l_ref[h] = alpha * l_ref[h] + jnp.sum(p, axis=-1, keepdims=True)
            acc_ref[:, sl] = alpha * acc_ref[:, sl] + jnp.dot(
                p.astype(v_ref.dtype), v_ref[:, sl],        # bf16 PV matmul
                preferred_element_type=jnp.float32)
            m_ref[h] = m_new

    not_skipped = k_start <= q_end       # tile has at least one unmasked entry
    needs_mask = k_end > q_start         # tile straddles the causal diagonal

    @pl.when(jnp.logical_and(not_skipped, needs_mask))
    def _diag_tile():
        update(True)

    @pl.when(jnp.logical_and(not_skipped, jnp.logical_not(needs_mask)))
    def _interior_tile():                # fully unmasked: no iota / no select
        update(False)

    @pl.when(ki == num_kv - 1)
    def _finalize():
        # Normalize in-place per head, then one lane-dense full-width store.
        for h in range(H):
            sl = slice(h * Dh, (h + 1) * Dh)
            acc_ref[:, sl] = acc_ref[:, sl] * pl.reciprocal(l_ref[h],
                                                            approx=False)
        o_ref[...] = acc_ref[...].astype(o_ref.dtype)


def flash_causal_attention(q, k, v, n_head, *, block_q=None, block_k=None):
    """q/k/v: [B, S, D] bf16 (q pre-scaled, q/k pre-rotated) -> [B, S, D] bf16."""
    B, S, D = q.shape
    tq = block_q if block_q is not None else _pick_tile(S, 8, 512)
    tk = block_k if block_k is not None else _pick_tile(S, 8, 512)
    assert S % tq == 0 and S % tk == 0
    assert tq % 8 == 0 or tq == S
    assert tk % 8 == 0 or tk == S

    grid = (B, S // tq, S // tk)

    def q_map(b, qi, ki):
        return (b, qi, 0)

    def kv_map(b, qi, ki):
        # Clamp: kv tiles entirely above the causal diagonal are skipped by
        # the kernel; mapping them to the last valid block index means Pallas
        # sees an unchanged block index and issues NO new DMA for them.
        last_valid = (qi * tq + tq - 1) // tk
        return (b, jnp.minimum(ki, last_valid), 0)

    return pl.pallas_call(
        _flash_attn_kernel,
        out_shape=jax.ShapeDtypeStruct((B, S, D), q.dtype),
        grid_spec=pltpu.PrefetchScalarGridSpec(
            num_scalar_prefetch=0,
            grid=grid,
            in_specs=[
                pl.BlockSpec((None, tq, D), q_map),
                pl.BlockSpec((None, tk, D), kv_map),
                pl.BlockSpec((None, tk, D), kv_map),
            ],
            out_specs=pl.BlockSpec((None, tq, D), q_map),
            scratch_shapes=[
                pltpu.VMEM((tq, D), jnp.float32),          # acc, lane-dense
                pltpu.VMEM((n_head, tq, 1), jnp.float32),  # running max
                pltpu.VMEM((n_head, tq, 1), jnp.float32),  # running sum
            ],
        ),
        # NOTE (v7x): B * (S // tq) should be >= 2 so both TensorCores get work.
        compiler_params=pltpu.CompilerParams(
            dimension_semantics=("parallel", "parallel", "arbitrary"),
            vmem_limit_bytes=_VMEM_LIMIT,
        ),
    )(q, k, v)


# ---------------------------------------------------------------------------
# Module wrapper (glue in plain JAX)
# ---------------------------------------------------------------------------

def attention_forward(x, w_qkv, w_o, n_head, *, block_q=None, block_k=None):
    """x: [B, S, D]; w_qkv: [D, 3D]; w_o: [D, D]  (weights pre-transposed)."""
    B, S, D = x.shape
    assert D % n_head == 0
    assert D % 128 == 0, "d_model must be a multiple of 128 (lane-dense slicing)"
    Dh = D // n_head
    assert Dh % 2 == 0

    # bf16 operands for all MXU work (f32 accumulation inside the kernels).
    x_bf = x.astype(jnp.bfloat16)
    w_qkv_bf = w_qkv.astype(jnp.bfloat16)
    w_o_bf = w_o.astype(jnp.bfloat16)

    # fused qkv projection (tiled Pallas matmul), emitted in bf16
    qkv = pallas_matmul(x_bf.reshape(B * S, D), w_qkv_bf,
                        out_dtype=jnp.bfloat16).reshape(B, S, 3 * D)

    # rotary tables (matches Rotary module: base 10000, dim = d_head)
    inv_freq = 1.0 / (10000.0 ** (jnp.arange(0, Dh, 2, dtype=jnp.float32) / Dh))
    t = jnp.arange(S, dtype=jnp.float32)
    freqs = jnp.outer(t, inv_freq)                        # [S, Dh/2]
    emb = jnp.concatenate([freqs, freqs], axis=-1)        # [S, Dh]
    cos = jnp.cos(emb)
    sign = jnp.concatenate([-jnp.ones((Dh // 2,), jnp.float32),
                            jnp.ones((Dh // 2,), jnp.float32)])
    sin_signed = jnp.sin(emb) * sign[None, :]             # folds rotate_half's signs

    # apply RoPE once (outside the attention kv loop) and split into three
    # contiguous bf16 arrays for clean, contiguous K/V tile DMAs.
    q, k, v = rope_split(qkv, cos, sin_signed, n_head)

    # causal flash attention; output already [B, S, D] lane-dense bf16
    z = flash_causal_attention(q, k, v, n_head, block_q=block_q, block_k=block_k)

    # output projection back to the input dtype
    out = pallas_matmul(z.reshape(B * S, D), w_o_bf,
                        out_dtype=x.dtype).reshape(B, S, D)
    return out


# Pure-JAX reference (f32) for correctness checking
def attention_ref(x, w_qkv, w_o, n_head):
    B, S, D = x.shape
    Dh = D // n_head
    hp = lax.Precision.HIGHEST
    qkv = jnp.matmul(x, w_qkv, precision=hp)
    qkv = qkv.reshape(B, S, 3, n_head, Dh)
    qkv = jnp.transpose(qkv, (2, 0, 3, 1, 4))
    q, k, v = qkv[0], qkv[1], qkv[2]

    inv_freq = 1.0 / (10000.0 ** (jnp.arange(0, Dh, 2, dtype=jnp.float32) / Dh))
    t = jnp.arange(S, dtype=jnp.float32)
    freqs = jnp.outer(t, inv_freq)
    emb = jnp.concatenate([freqs, freqs], axis=-1)
    cos = jnp.cos(emb)[None, None]
    sin = jnp.sin(emb)[None, None]

    def rot_half(u):
        u1, u2 = jnp.split(u, 2, axis=-1)
        return jnp.concatenate([-u2, u1], axis=-1)

    q = q * cos + rot_half(q) * sin
    k = k * cos + rot_half(k) * sin

    scores = jnp.einsum("bhqd,bhkd->bhqk", q, k, precision=hp) / jnp.sqrt(
        jnp.float32(Dh))
    mask = jnp.tril(jnp.ones((S, S), dtype=bool))
    scores = jnp.where(mask[None, None], scores, -jnp.inf)
    pattern = jax.nn.softmax(scores, axis=-1)
    z = jnp.einsum("bhqk,bhkd->bhqd", pattern, v, precision=hp)
    z = jnp.transpose(z, (0, 2, 1, 3)).reshape(B, S, D)
    return jnp.matmul(z, w_o, precision=hp)


if __name__ == "__main__":
    # Config defaults: n_head=4, d_model=4*64=256 (d_head=64); small batch/seq.
    batch, seq = 2, 32
    n_head, d_model = 4, 256
    key = jax.random.PRNGKey(0)
    kx, kqkv, ko = jax.random.split(key, 3)

    x = jax.random.normal(kx, (batch, seq, d_model), dtype=jnp.float32)
    # nn.Linear(d_model, 3*d_model, bias=False) weight is [3D, D]; stored
    # pre-transposed as [D, 3D] so the kernel does x @ W.
    scale = 1.0 / math.sqrt(d_model)
    w_qkv = scale * jax.random.normal(kqkv, (d_model, 3 * d_model), dtype=jnp.float32)
    w_o = scale * jax.random.normal(ko, (d_model, d_model), dtype=jnp.float32)

    # block_q = block_k = 16 so the online-softmax kv loop, the causal
    # skip/clamp path, and both masked/unmasked code paths are exercised
    # (2 q-tiles x 2 kv-tiles per batch element).
    out = attention_forward(x, w_qkv, w_o, n_head, block_q=16, block_k=16)
    out = jax.block_until_ready(out)

    ref = attention_ref(x, w_qkv, w_o, n_head)
    assert out.shape == (batch, seq, d_model)
    max_err = float(jnp.max(jnp.abs(out - ref)))
    rel_err = float(jnp.linalg.norm(out - ref) / jnp.linalg.norm(ref))
    # bf16 MXU operands with f32 accumulation => looser tolerance than pure f32.
    assert rel_err < 3e-2 and max_err < 0.15, (
        f"mismatch vs reference (rel {rel_err:.4g}, max abs {max_err:.4g})")

    print("KERNEL_OK")
</pallas_src>

<mosaic_0001>
module attributes {stable_mosaic.version = 11 : i64} {
  func.func @_matmul_kernel(%arg0: i32, %arg1: i32, %arg2: i32, %arg3: memref<64x256xbf16, #tpu.memory_space<vmem>>, %arg4: memref<256x384xbf16, #tpu.memory_space<vmem>>, %arg5: memref<64x384xbf16, #tpu.memory_space<vmem>>, %arg6: memref<64x384xf32, #tpu.memory_space<vmem>>) attributes {dimension_semantics = [#tpu.dimension_semantics<parallel>, #tpu.dimension_semantics<parallel>, #tpu.dimension_semantics<arbitrary>], iteration_bounds = array<i64: 1, 2, 1>, scalar_prefetch = 0 : i64, scratch_operands = 1 : i64, tpu.core_type = #tpu.core_type<tc>, window_params = [{transform_indices = @transform_0, window_bounds = array<i64: 64, 256>}, {transform_indices = @transform_1, window_bounds = array<i64: 256, 384>}, {transform_indices = @transform_2, window_bounds = array<i64: 64, 384>}]} {
    %c0_i32 = arith.constant 0 : i32
    %0 = arith.cmpi eq, %arg2, %c0_i32 : i32
    %1 = arith.extui %0 : i1 to i32
    %c0_i32_0 = arith.constant 0 : i32
    %2 = arith.cmpi ne, %1, %c0_i32_0 : i32
    scf.if %2 {
      %cst_10 = arith.constant 0.000000e+00 : f32
      %12 = vector.broadcast %cst_10 : f32 to vector<64x384xf32>
      %c0_11 = arith.constant 0 : index
      %c0_12 = arith.constant 0 : index
      %13 = vector.load %arg6[%c0_11, %c0_12] : memref<64x384xf32, #tpu.memory_space<vmem>>, vector<64x384xf32>
      tpu.vector_store %arg6[%c0_11, %c0_12], %12 {strides = array<i32>} : memref<64x384xf32, #tpu.memory_space<vmem>>, vector<64x384xf32>,
    } else {
    }
    %c0 = arith.constant 0 : index
    %c0_1 = arith.constant 0 : index
    %3 = vector.load %arg6[%c0, %c0_1] : memref<64x384xf32, #tpu.memory_space<vmem>>, vector<64x384xf32>
    %c0_2 = arith.constant 0 : index
    %c0_3 = arith.constant 0 : index
    %4 = vector.load %arg3[%c0_2, %c0_3] : memref<64x256xbf16, #tpu.memory_space<vmem>>, vector<64x256xbf16>
    %c0_4 = arith.constant 0 : index
    %c0_5 = arith.constant 0 : index
    %5 = vector.load %arg4[%c0_4, %c0_5] : memref<256x384xbf16, #tpu.memory_space<vmem>>, vector<256x384xbf16>
    %cst = arith.constant dense<0.000000e+00> : vector<64x384xf32>
    %6 = tpu.matmul %4, %5, %cst {dimension_numbers = #tpu.dot_dimension_numbers<[1], [0], [0], [1], [0, 0, 1, 1], [], []>} : vector<64x256xbf16>, vector<256x384xbf16>, vector<64x384xf32> -> vector<64x384xf32>
    %7 = arith.addf %3, %6 : vector<64x384xf32>
    %c0_6 = arith.constant 0 : index
    %c0_7 = arith.constant 0 : index
    %8 = vector.load %arg6[%c0_6, %c0_7] : memref<64x384xf32, #tpu.memory_space<vmem>>, vector<64x384xf32>
    tpu.vector_store %arg6[%c0_6, %c0_7], %7 {strides = array<i32>} : memref<64x384xf32, #tpu.memory_space<vmem>>, vector<64x384xf32>,
    %c0_i32_8 = arith.constant 0 : i32
    %9 = arith.cmpi eq, %arg2, %c0_i32_8 : i32
    %10 = arith.extui %9 : i1 to i32
    %c0_i32_9 = arith.constant 0 : i32
    %11 = arith.cmpi ne, %10, %c0_i32_9 : i32
    scf.if %11 {
      %c0_10 = arith.constant 0 : index
      %c0_11 = arith.constant 0 : index
      %12 = vector.load %arg6[%c0_10, %c0_11] : memref<64x384xf32, #tpu.memory_space<vmem>>, vector<64x384xf32>
      %13 = arith.truncf %12 : vector<64x384xf32> to vector<64x384xbf16>
      %c0_12 = arith.constant 0 : index
      %c0_13 = arith.constant 0 : index
      %14 = vector.load %arg5[%c0_12, %c0_13] : memref<64x384xbf16, #tpu.memory_space<vmem>>, vector<64x384xbf16>
      tpu.vector_store %arg5[%c0_12, %c0_13], %13 {strides = array<i32>} : memref<64x384xbf16, #tpu.memory_space<vmem>>, vector<64x384xbf16>,
    } else {
    }
    return
  }
  func.func @transform_0(%arg0: i32, %arg1: i32, %arg2: i32) -> (i32, i32) {
    %c0_i32 = arith.constant 0 : i32
    return %arg0, %arg2 : i32, i32
  }
  func.func @transform_1(%arg0: i32, %arg1: i32, %arg2: i32) -> (i32, i32) {
    %c0_i32 = arith.constant 0 : i32
    return %arg2, %arg1 : i32, i32
  }
  func.func @transform_2(%arg0: i32, %arg1: i32, %arg2: i32) -> (i32, i32) {
    %c0_i32 = arith.constant 0 : i32
    return %arg0, %arg1 : i32, i32
  }
}

</mosaic_0001>

<bundles_post_ra>
// kernel: tpu_custom_call.1
= control target key start
LH: loop header
LB: loop body
LE: loop exit
PB: predicated region body
PF: predicated region fallthrough
CT: control target
= control target key end

     0   :  { %7 = vsyncpa [#allocation4], 0  ;;  %s1847_s0 = inlined_call_operand.hbm [shape: bf16[64,256], index: 0, kind: input, shape index: {}]   ;;  %s1848_s1 = inlined_call_operand.hbm [shape: bf16[256,768], index: 1, kind: input, shape index: {}]   ;;  %s1849_s2 = inlined_call_operand.hbm [shape: bf16[64,768], index: 2, kind: output, shape index: {}]  }
   0x1   :  { %8 = vsyncpa [#allocation7], 0 }
   0x2   :  { %10 = vsyncpa [#allocation7 + $0x1], 0 }
   0x3   :  { %11 = vsyncpa [#allocation5], 0 }
   0x4   :  { %13 = vsyncpa [#allocation5 + $0x1], 0  ;;  %s1549_s9 = smov 0   ;;  %s1551_s10 = smov 0  }
   0x5   :  { %s1553_s11 = smov 0   ;;  %s1555_s12 = smov 0  }
   0x6   :  { %s1557_s13 = smov 0   ;;  %s1559_s14 = smov 0  }
   0x7 LB: > { %s1076_s15 = sadd.s32 4294967295, %s1521_s14   ;;  %s1077_s16 = sadd.s32 4294967294, %s1521_s14   ;;  %s1521_s14 = sphi %s1559_s14, %s19_s14   ;;  %s1517_s13 = sphi %s1557_s13, %s1877_s13   ;;  %s1513_s12 = sphi %s1555_s12, %s1876_s12   ;;  %s1509_s11 = sphi %s1553_s11, %s1875_s11   ;;  %s1505_s10 = sphi %s1551_s10, %s1874_s10   ;;  %s1501_s9 = sphi %s1549_s9, %s1873_s9  }
   0x8   : > { %s75_s17 = sadd.s32 1, %s1509_s11  ;;  %p82_p0 = scmp.ne.s32.totalorder %s1509_s11, %s1505_s10 }
   0x9   : > { %p83_p1 = scmp.eq.s32.totalorder %s1521_s14, 0  ;;  %p88_p2 = scmp.ne.s32.totalorder %s1505_s10, %s1501_s9 }
   0xa   : > { %p1587_p3 = scmp.eq.s32.totalorder %s1076_s15, 0  ;;  %p114_p4 = scmp.eq.s32.totalorder %s1076_s15, 1 }
   0xb   : > { %p1591_p5 = por %p83_p1, %p82_p0  ;;  %p120_p6 = scmp.eq.s32.totalorder %s1077_s16, 1 }
   0xc   : > { %s1856_s18 = scalar_select %p1587_p3, 1, 0 }
   0xd   : > { %p1597_p7 = por %p1587_p3, %p88_p2  ;;  %p1601_p8 = por %p114_p4, %p82_p0 }
   0xe   : > { %p1605_p9 = por %p120_p6, %p88_p2  ;;  %p1078_p10 = scmp.ge.s32.totalorder %s1521_s14, 1 }
   0xf   : > { %s1858_s20 = scalar_select %p1597_p7, 1, 0 }
  0x10   : > { %s1859_s21 = scalar_select %p1601_p8, 1, 0 }
  0x11   : > { %s1860_s22 = scalar_select %p1605_p9, 1, 0 }
  0x12   : > { %p127_p11 = scmp.lt.s32.totalorder %s1521_s14, 3  ;;  %s1523_s24 = smov [#allocation3]  }
  0x13   : > { %s145_s25 = sshll.u32 %s1523_s24, 4  ;;  %p1241_p1 = scmp.lt.s32.totalorder %s1521_s14, 2  ;;  %s1615_s25 = int_to_ptr.vmem [resolvable:$true] %s145_s25 }
  0x14   : > { %p1611_p12 = pnand %p1078_p10, %p127_p11  ;;  %s34_s28 = sadd.s32 1, %s1517_s13 }
  0x15   : > { %p1629_p4 = pnand %p1241_p1, %p1591_p5  ;;  %p1634_p6 = scmp.ge.s32.totalorder %s34_s28, 2 }
  0x16   : > { %s1861_s23 = scalar_select %p1611_p12, 1, 0 }
  0x17   : > { %p1228_p13 = pneg %p1611_p12  ;;  %s1377_s4 = scalar_lea.hbm %s1847_s0, 1024 }
  0x18   : > { %s1863_s27 = scalar_select %p1629_p4, 1, 0 }
  0x19   : > { %p1623_p2 = pnand %p1228_p13, %p1587_p3  ;;  %p1378_p10 = scmp.ne.s32.totalorder %s1847_s0, %s1377_s4 }
  0x1a   : > { %s1864_s29 = scalar_select %p1634_p6, 1, 0 }
  0x1b   : > { %p1379_p11 = pneg %p1623_p2  ;;  %p1384_p1 = scmp.lt.u32.totalorder %s1377_s4, %s1847_s0 }
  0x1d   : > { %p1380_p13 = pnand %p1379_p11, %p1378_p10 }
  0x1f   : > { %p1381_p5 = pneg %p1380_p13 }
  0x21   : > { %p1386_p0 = pnand %p1384_p1, %p1381_p5 }
  0x23   : > { %1389 = shalt.err (!%p1386_p0)
}
  0x24   : > { %s1390_s15 = scalar_lea.vmem %s1615_s25, 1024  ;;  %p1398_p3 = scmp.lt.s32.totalorder %s1615_s25, %s1615_s25 }
  0x25   : > { %p1391_p9 = scmp.ne.s32.totalorder %s1615_s25, %s1390_s15  ;;  %p1399_p12 = scmp.lt.s32.totalorder %s1390_s15, %s1390_s15 }
  0x27   : > { %p1393_p8 = pnand %p1391_p9, %p1379_p11  ;;  %p1400_p4 = por %p1399_p12, %p1398_p3 }
  0x29   : > { %p1394_p7 = pneg %p1393_p8 }
  0x2b   : > { %p1401_p6 = pnand %p1400_p4, %p1394_p7 }
  0x2d   : > { %1404 = shalt.err (!%p1401_p6)
}
  0x2e   : > { %s1524_s16 = smov 128   ;;  %s1525_s19 = smov 8  }
  0x2f   : > { %1231 = dma.hbm_to_vmem [thread:$0]  (!%p1623_p2), %s1847_s0, 1024, %s1615_s25, [#allocation4], %s1524_s16, %s1524_s16, %s1525_s19  }
  0x30   : > { %s159_s3 = sand.u32 1, %s1509_s11   ;;  %p1865_p3 = scmp.ne.s32.totalorder %s1864_s29, 0 }
  0x31   : > { %s1217_s4 = smul.u32 384, %s159_s3  ;;  %s1679_s16 = scalar_lea.sflag [#allocation7], %s159_s3 }
  0x32   : > { %s1879_s28 = smov (%p1865_p3, %s34_s28), 0  ;;  %s1159_s6 = smul.u32 192, %s1517_s13 }
  0x33   : > { %s71_s5 = ssub.s32 %s1517_s13, %s1879_s28  ;;  %s163_s25 = scalar_lea.vmem [#allocation6], %s1217_s4 }
  0x34   : > { %p73_p7 = scmp.eq.s32.totalorder %s71_s5, 0  ;;  %s1670_s15 = scalar_lea.hbm %s1848_s1, %s1159_s6 }
  0x35   : > { %s173_s26 = sshll.u32 %s163_s25, 4  ;;  %s1405_s19 = scalar_lea.hbm %s1670_s15, 6144  ;;  %s1677_s26 = int_to_ptr.vmem [resolvable:$true] %s173_s26 }
  0x36   : > { %s1675_s29 = scalar_select %p73_p7, %s1509_s11, %s75_s17  }
  0x37   : > { %p1406_p8 = scmp.ne.s32.totalorder %s1670_s15, %s1405_s19  ;;  %p1866_p9 = scmp.ne.s32.totalorder %s1863_s27, 0 }
  0x38   : > { %s1410_s4 = scalar_lea.hbm %s1848_s1, 12288  ;;  %p1411_p4 = scmp.lt.u32.totalorder %s1670_s15, %s1848_s1 }
  0x39   : > { %p1407_p12 = pneg %p1866_p9  ;;  %p1412_p6 = scmp.lt.u32.totalorder %s1410_s4, %s1405_s19 }
  0x3a   : > { %p1414_p11 = scmp.lt.u32.totalorder %s1405_s19, %s1670_s15 }
  0x3b   : > { %p1408_p0 = pnand %p1407_p12, %p1406_p8  ;;  %p1413_p10 = por %p1412_p6, %p1411_p4 }
  0x3d   : > { %p1409_p2 = pneg %p1408_p0  ;;  %p1415_p13 = por %p1414_p11, %p1413_p10 }
  0x3f   : > { %p1416_p5 = pnand %p1415_p13, %p1409_p2 }
  0x41   : > { %1419 = shalt.err (!%p1416_p5)
}
  0x42   : > { %s1420_s17 = scalar_lea.vmem %s1677_s26, 6144  ;;  %s1526_s3 = smov [#allocation6]  }
  0x43   : > { %p1421_p1 = scmp.ne.s32.totalorder %s1677_s26, %s1420_s17  ;;  %s1425_s7 = sshll.u32 %s1526_s3, 4  ;;  %s1426_s7 = int_to_ptr.vmem [resolvable:$false] %s1425_s7 }
  0x44   : > { %s1427_s8 = scalar_lea.vmem %s1426_s7, 12288  ;;  %p1428_p8 = scmp.lt.s32.totalorder %s1677_s26, %s1426_s7 }
  0x45   : > { %p1423_p3 = pnand %p1421_p1, %p1407_p12  ;;  %p1429_p0 = scmp.lt.s32.totalorder %s1427_s8, %s1420_s17 }
  0x47   : > { %p1424_p7 = pneg %p1423_p3  ;;  %p1430_p4 = por %p1429_p0, %p1428_p8 }
  0x49   : > { %p1431_p6 = pnand %p1430_p4, %p1424_p7 }
  0x4b   : > { %1434 = shalt.err (!%p1431_p6)
}
  0x4c   : > { %s1527_s25 = smov 384   ;;  %s1528_s19 = smov 192  }
  0x4d   : > { %s1529_s24 = smov 12   ;;  %p1867_p12 = scmp.ne.s32.totalorder %s1861_s23, 0 }
  0x4e   : > { %1235 = dma.hbm_to_vmem [thread:$0]  (!%p1866_p9), %s1670_s15, 6144, %s1677_s26, %s1679_s16, %s1527_s25, %s1528_s19, %s1529_s24  }
  0x4f   : > { %185 = sbr.rel (%p1867_p12) target bundleno = 414 (0x19e), region = 28  ;;  %p1868_p2 = scmp.ne.s32.totalorder (!%p1867_p12), %s1856_s18, 0 }
  0x56   : > { %1488 = dma.done.wait (%p1868_p2), [#allocation4], 1024  }
  0x57   : > { %1490 = vsyncadd (%p1868_p2), [#allocation4], 4294966272  ;;  %s1714_s30 = sand.u32 1, %s1505_s10   ;;  %p1869_p9 = scmp.ne.s32.totalorder %s1858_s20, 0 }
  0x58   : > { %s1218_s4 = smul.u32 384, %s1714_s30  ;;  %s192_s5 = scalar_lea.sflag [#allocation7], %s1714_s30 }
  0x5a   : > { %s1718_s6 = scalar_lea.vmem [#allocation6], %s1218_s4 }
  0x5b   : > { %1492 = dma.done.wait (%p1869_p9), %s192_s5, 6144  }
  0x5c   : > { %1494 = vsyncadd (%p1869_p9), %s192_s5, 4294961152  ;;  %v1301_v0 = vld [vmem:[%s1718_s6 + $0x4] ss:$12 sps:$4 sm:$0xff]   ;;  %v1303_v1 = vld [vmem:[%s1718_s6] ss:$12 sps:$4 sm:$0xff]   ;;  %s1219_s18 = smul.u32 96, %s1714_s30 }
  0x5d   : > { %643 = vmatprep.subr.bf16.mxu0 %v1301_v0  ;;  %v1304_v2 = vld [vmem:[%s1718_s6 + $0x1c] ss:$12 sps:$4 sm:$0xff]   ;;  %v1306_v3 = vld [vmem:[%s1718_s6 + $0x18] ss:$12 sps:$4 sm:$0xff]   ;;  %v1307_v4 = vld [vmem:[%s1718_s6 + $0x34] ss:$12 sps:$4 sm:$0xff]  }
  0x5e   : > { %644 = vmatpush1.bf16.msra.mxu0 %v1303_v1  ;;  %v1309_v5 = vld [vmem:[%s1718_s6 + $0x30] ss:$12 sps:$4 sm:$0xff]   ;;  %v1310_v6 = vld [vmem:[%s1718_s6 + $0x4c] ss:$12 sps:$4 sm:$0xff]   ;;  %v1322_v7 = vld [vmem:[%s1718_s6 + $0xc8] ss:$12 sps:$4 sm:$0xff]  }
  0x5f   : > { %645 = vmatprep.subr.bf16.mxu0 %v1304_v2  ;;  %v1312_v8 = vld [vmem:[%s1718_s6 + $0x48] ss:$12 sps:$4 sm:$0xff]   ;;  %v1313_v9 = vld [vmem:[%s1718_s6 + $0x64] ss:$12 sps:$4 sm:$0xff]   ;;  %1177 = vmatprep.subr.bf16.mxu1 %v1322_v7  ;;  %v1327_v11 = vld [vmem:[%s1718_s6 + $0xe0] ss:$12 sps:$4 sm:$0xff]  }
  0x60   : > { %v1325_v10 = vld [vmem:[%s1718_s6 + $0x8] ss:$12 sps:$4 sm:$0xff]   ;;  %v1315_v12 = vld [vmem:[%s1718_s6 + $0x60] ss:$12 sps:$4 sm:$0xff]   ;;  %v1332_v15 = vld [vmem:[%s1718_s6 + $0xf8] ss:$12 sps:$4 sm:$0xff]  }
  0x61   : > { %1178 = vmatpush3.bf16.msra.mxu1 %v1325_v10  ;;  %v1316_v13 = vld [vmem:[%s1718_s6 + $0x7c] ss:$12 sps:$4 sm:$0xff]   ;;  %v1330_v14 = vld [vmem:[%s1718_s6 + $0x20] ss:$12 sps:$4 sm:$0xff]   ;;  %v1318_v16 = vld [vmem:[%s1718_s6 + $0x78] ss:$12 sps:$4 sm:$0xff]  }
  0x62   : > { %646 = vmatpush1.bf16.msra.mxu0 %v1306_v3  ;;  %1179 = vmatprep.subr.bf16.mxu1 %v1327_v11  ;;  %v1335_v17 = vld [vmem:[%s1718_s6 + $0x38] ss:$12 sps:$4 sm:$0xff]   ;;  %v1319_v18 = vld [vmem:[%s1718_s6 + $0x94] ss:$12 sps:$4 sm:$0xff]   ;;  %v1337_v19 = vld [vmem:[%s1718_s6 + $0x110] ss:$12 sps:$4 sm:$0xff]  }
  0x63   : > { %647 = vmatprep.subr.bf16.mxu0 %v1307_v4  ;;  %v1321_v20 = vld [vmem:[%s1718_s6 + $0x90] ss:$12 sps:$4 sm:$0xff]   ;;  %v1342_v22 = vld [vmem:[%s1718_s6 + $0x128] ss:$12 sps:$4 sm:$0xff]   ;;  %v1323_v23 = vld [vmem:[%s1718_s6 + $0xac] ss:$12 sps:$4 sm:$0xff]  }
  0x64   : > { %v1340_v21 = vld [vmem:[%s1718_s6 + $0x50] ss:$12 sps:$4 sm:$0xff]   ;;  %v1326_v24 = vld [vmem:[%s1718_s6 + $0xa8] ss:$12 sps:$4 sm:$0xff]   ;;  %v1347_v26 = vld [vmem:[%s1718_s6 + $0x140] ss:$12 sps:$4 sm:$0xff]  }
  0x65   : > { %1180 = vmatpush3.bf16.msra.mxu1 %v1330_v14  ;;  %v1345_v25 = vld [vmem:[%s1718_s6 + $0x68] ss:$12 sps:$4 sm:$0xff]   ;;  %v1328_v27 = vld [vmem:[%s1718_s6 + $0xc4] ss:$12 sps:$4 sm:$0xff]   ;;  %v1331_v28 = vld [vmem:[%s1718_s6 + $0xc0] ss:$12 sps:$4 sm:$0xff]  }
  0x66   : > { %648 = vmatpush1.bf16.msra.mxu0 %v1309_v5  ;;  %1181 = vmatprep.subr.bf16.mxu1 %v1332_v15  ;;  %v1350_v29 = vld [vmem:[%s1718_s6 + $0x80] ss:$12 sps:$4 sm:$0xff]   ;;  %v1352_v30 = vld [vmem:[%s1718_s6 + $0x158] ss:$12 sps:$4 sm:$0xff]   ;;  %v1333_v31 = vld [vmem:[%s1718_s6 + $0xdc] ss:$12 sps:$4 sm:$0xff]  }
  0x67   : > { %649 = vmatprep.subr.bf16.mxu0 %v1310_v6  ;;  %v1355_v32 = vld [vmem:[%s1718_s6 + $0x98] ss:$12 sps:$4 sm:$0xff]   ;;  %v1357_v34 = vld [vmem:[%s1718_s6 + $0x170] ss:$12 sps:$4 sm:$0xff]   ;;  %v1338_v35 = vld [vmem:[%s1718_s6 + $0xf4] ss:$12 sps:$4 sm:$0xff]  }
  0x68   : > { %v1336_v33 = vld [vmem:[%s1718_s6 + $0xd8] ss:$12 sps:$4 sm:$0xff]   ;;  %v1360_v37 = vld [vmem:[%s1718_s6 + $0xb0] ss:$12 sps:$4 sm:$0xff]   ;;  %v1362_v40 = vld [vmem:[#allocation3] ss:$8 sps:$4 sm:$0xff]  }
  0x69   : > { %1182 = vmatpush3.bf16.msra.mxu1 %v1335_v17  ;;  %v1364_v36 = vld [vmem:[#allocation3 + $0x4] ss:$8 sps:$4 sm:$0xff]   ;;  %v1341_v38 = vld [vmem:[%s1718_s6 + $0xf0] ss:$12 sps:$4 sm:$0xff]   ;;  %v1346_v42 = vld [vmem:[%s1718_s6 + $0x108] ss:$12 sps:$4 sm:$0xff]  }
  0x6a   : > { %650 = vmatpush1.bf16.msra.mxu0 %v1312_v8  ;;  %1183 = vmatprep.subr.bf16.mxu1 %v1337_v19  ;;  %v1343_v39 = vld [vmem:[%s1718_s6 + $0x10c] ss:$12 sps:$4 sm:$0xff]   ;;  %v1368_v41 = vld [vmem:[#allocation3 + $0x14] ss:$8 sps:$4 sm:$0xff]   ;;  %v1348_v43 = vld [vmem:[%s1718_s6 + $0x124] ss:$12 sps:$4 sm:$0xff]  }
  0x6b   : > { %651 = vmatprep.subr.bf16.mxu0 %v1313_v9  ;;  %748 = vmatprep.mubr.bf16.mxu1 %v1364_v36  ;;  %v1351_v44 = vld [vmem:[%s1718_s6 + $0x120] ss:$12 sps:$4 sm:$0xff]   ;;  %v1353_v45 = vld [vmem:[%s1718_s6 + $0x13c] ss:$12 sps:$4 sm:$0xff]   ;;  %v1370_v46 = vld [vmem:[#allocation3 + $0x10] ss:$8 sps:$4 sm:$0xff]  }
  0x6c   : > { %675 = vmatprep.mubr.bf16.mxu0 %v1364_v36  ;;  %v1371_v47 = vld [vmem:[#allocation3 + $0x24] ss:$8 sps:$4 sm:$0xff]   ;;  %v1358_v49 = vld [vmem:[%s1718_s6 + $0x154] ss:$12 sps:$4 sm:$0xff]   ;;  %v1361_v50 = vld [vmem:[%s1718_s6 + $0x150] ss:$12 sps:$4 sm:$0xff]  }
  0x6d   : > { %1184 = vmatpush3.bf16.msra.mxu1 %v1340_v21  ;;  %v1356_v48 = vld [vmem:[%s1718_s6 + $0x138] ss:$12 sps:$4 sm:$0xff]   ;;  %v1373_v52 = vld [vmem:[#allocation3 + $0x20] ss:$8 sps:$4 sm:$0xff]   ;;  %v1374_v53 = vld [vmem:[#allocation3 + $0x34] ss:$8 sps:$4 sm:$0xff]  }
  0x6e   : > { %652 = vmatpush1.bf16.msra.mxu0 %v1315_v12  ;;  %1185 = vmatprep.subr.bf16.mxu1 %v1342_v22  ;;  %v1365_v51 = vld [vmem:[%s1718_s6 + $0x16c] ss:$12 sps:$4 sm:$0xff]   ;;  %v1367_v54 = vld [vmem:[%s1718_s6 + $0x168] ss:$12 sps:$4 sm:$0xff]   ;;  %s1773_s20 = scalar_lea.vmem [#allocation8], %s1219_s18  ;;  %s1176_s23 = smul.u32 192, %s1513_s12 }
  0x6f   : > { %653 = vmatprep.subr.bf16.mxu0 %v1316_v13  ;;  %v1376_v55 = vld [vmem:[#allocation3 + $0x30] ss:$8 sps:$4 sm:$0xff]   ;;  %s969_s27 = sshll.u32 %s1773_s20, 4  ;;  %s953_s12 = scalar_lea.sflag [#allocation5], %s1714_s30  ;;  %s1796_s27 = int_to_ptr.vmem [resolvable:$true] %s969_s27 }
  0x70   : > { %s1794_s16 = scalar_lea.hbm %s1849_s2, %s1176_s23  ;;  %s1435_s17 = scalar_lea.vmem %s1796_s27, 1536 }
  0x71   : > { %1186 = vmatpush3.bf16.msra.mxu1 %v1345_v25  ;;  %p1436_p10 = scmp.ne.s32.totalorder %s1796_s27, %s1435_s17  ;;  %p1870_p11 = scmp.ne.s32.totalorder %s1859_s21, 0 }
  0x72   : > { %654 = vmatpush1.bf16.msra.mxu0 %v1318_v16  ;;  %1187 = vmatprep.subr.bf16.mxu1 %v1347_v26  ;;  %s1530_s3 = smov [#allocation8]  }
  0x73   : > { %655 = vmatprep.subr.bf16.mxu0 %v1319_v18  ;;  %p1437_p13 = pnand %p1436_p10, %p1870_p11  ;;  %s1439_s7 = sshll.u32 %s1530_s3, 4  ;;  %s1440_s7 = int_to_ptr.vmem [resolvable:$false] %s1439_s7 }
  0x74   : > { %s1441_s8 = scalar_lea.vmem %s1440_s7, 3072  ;;  %p1442_p1 = scmp.lt.s32.totalorder %s1796_s27, %s1440_s7 }
  0x75   : > { %1188 = vmatpush3.bf16.msra.mxu1 %v1350_v29  ;;  %p1438_p5 = pneg %p1437_p13  ;;  %p1443_p3 = scmp.lt.s32.totalorder %s1441_s8, %s1435_s17 }
  0x76   : > { %656 = vmatpush1.bf16.msra.mxu0 %v1321_v20  ;;  %1189 = vmatprep.subr.bf16.mxu1 %v1352_v30 }
  0x77   : > { %657 = vmatprep.subr.bf16.mxu0 %v1323_v23  ;;  %p1444_p7 = por %p1443_p3, %p1442_p1 }
  0x79   : > { %1190 = vmatpush3.bf16.msra.mxu1 %v1355_v32  ;;  %p1445_p8 = pnand %p1444_p7, %p1438_p5 }
  0x7a   : > { %658 = vmatpush1.bf16.msra.mxu0 %v1326_v24  ;;  %1191 = vmatprep.subr.bf16.mxu1 %v1357_v34 }
  0x7b   : > { %659 = vmatprep.subr.bf16.mxu0 %v1328_v27 }
  0x7d   : > { %1192 = vmatpush3.bf16.msra.mxu1 %v1360_v37 }
  0x7e   : > { %660 = vmatpush1.bf16.msra.mxu0 %v1331_v28 }
  0x7f   : > { %661 = vmatprep.subr.bf16.mxu0 %v1333_v31 }
  0x80   : > { %749 = vmatmul.mubr.bf16.vlgmr.msra.gmra.mrb[0].mxu1 %v1362_v40 }
  0x81   : > { %756 = vmatprep.mubr.bf16.mxu1 %v1368_v41 }
  0x82   : > { %662 = vmatpush1.bf16.msra.mxu0 %v1336_v33 }
  0x83   : > { %663 = vmatprep.subr.bf16.mxu0 %v1338_v35 }
  0x86   : > { %664 = vmatpush1.bf16.msra.mxu0 %v1341_v38 }
  0x87   : > { %665 = vmatprep.subr.bf16.mxu0 %v1343_v39 }
  0x88   : > { %757 = vmatmul.mubr.bf16.gmra.mrb[4].mxu1 %v1370_v46 }
  0x89   : > { %764 = vmatprep.mubr.bf16.mxu1 %v1371_v47 }
  0x8a   : > { %666 = vmatpush1.bf16.msra.mxu0 %v1346_v42 }
  0x8b   : > { %667 = vmatprep.subr.bf16.mxu0 %v1348_v43 }
  0x8e   : > { %668 = vmatpush1.bf16.msra.mxu0 %v1351_v44 }
  0x8f   : > { %669 = vmatprep.subr.bf16.mxu0 %v1353_v45 }
  0x90   : > { %765 = vmatmul.mubr.bf16.gmra.mrb[8].mxu1 %v1373_v52 }
  0x91   : > { %772 = vmatprep.mubr.bf16.mxu1 %v1374_v53 }
  0x92   : > { %670 = vmatpush1.bf16.msra.mxu0 %v1356_v48 }
  0x93   : > { %671 = vmatprep.subr.bf16.mxu0 %v1358_v49 }
  0x96   : > { %672 = vmatpush1.bf16.msra.mxu0 %v1361_v50 }
  0x97   : > { %673 = vmatprep.subr.bf16.mxu0 %v1365_v51 }
  0x98   : > { %773 = vmatmul.mubr.bf16.gmra.mrb[12].mxu1 %v1376_v55 }
  0x9a   : > { %674 = vmatpush1.bf16.msra.mxu0 %v1367_v54 }
  0x9d   : > { %676 = vmatmul.mubr.bf16.vlgmr.msra.gmra.mrb[0].mxu0 %v1362_v40 }
  0x9e   : > { %685 = vmatprep.mubr.bf16.mxu0 %v1368_v41 }
  0xa5   : > { %686 = vmatmul.mubr.bf16.gmra.mrb[4].mxu0 %v1370_v46 }
  0xa6   : > { %695 = vmatprep.mubr.bf16.mxu0 %v1371_v47 }
  0xad   : > { %696 = vmatmul.mubr.bf16.gmra.mrb[8].mxu0 %v1373_v52 }
  0xae   : > { %705 = vmatprep.mubr.bf16.mxu0 %v1374_v53 }
  0xb5   : > { %706 = vmatmul.mubr.bf16.gmra.mrb[12].mxu0 %v1376_v55 }
 0x153   : > { %v1193_v56 = vpop.f32.mrb[0].mxu1 }
 0x154   : > { %v1194_v57 = vpop.f32.mrb[1].mxu1 }
 0x155   : > { %v1195_v58 = vadd.f32 %v1194_v57, %v1193_v56  ;;  %v1196_v59 = vpop.f32.mrb[2].mxu1 }
 0x156   : > { %v1197_v60 = vpop.f32.mrb[3].mxu1 }
 0x157   : > { %v1161_v61 = vpack.c.bf16 %v1195_v58, %v1195_v58  ;;  %v1198_v62 = vadd.f32 %v1197_v60, %v1196_v59 }
 0x159   : > { %937 = vst [vmem:[%s1773_s20 + $0x8] sm:$0xf] %v1161_v61  ;;  %v1163_v63 = vpack.c.bf16 %v1198_v62, %v1198_v62 }
 0x15b   : > { %939 = vst [vmem:[%s1773_s20 + $0x14] sm:$0xf] %v1163_v63  ;;  %v1199_v0 = vpop.f32.mrb[4].mxu1 }
 0x15c   : > { %v1200_v1 = vpop.f32.mrb[5].mxu1 }
 0x15d   : > { %v1201_v2 = vadd.f32 %v1200_v1, %v1199_v0  ;;  %v1202_v3 = vpop.f32.mrb[6].mxu1 }
 0x15e   : > { %v1203_v4 = vpop.f32.mrb[7].mxu1 }
 0x15f   : > { %v1165_v5 = vpack.c.bf16 %v1201_v2, %v1201_v2  ;;  %v1204_v6 = vadd.f32 %v1203_v4, %v1202_v3 }
 0x161   : > { %941 = vst [vmem:[%s1773_s20 + $0x20] sm:$0xf] %v1165_v5  ;;  %v1167_v7 = vpack.c.bf16 %v1204_v6, %v1204_v6 }
 0x163   : > { %943 = vst [vmem:[%s1773_s20 + $0x2c] sm:$0xf] %v1167_v7  ;;  %v1205_v8 = vpop.f32.mrb[8].mxu1 }
 0x164   : > { %v1206_v9 = vpop.f32.mrb[9].mxu1 }
 0x165   : > { %v1207_v10 = vadd.f32 %v1206_v9, %v1205_v8  ;;  %v1208_v11 = vpop.f32.mrb[10].mxu1 }
 0x166   : > { %v1209_v12 = vpop.f32.mrb[11].mxu1 }
 0x167   : > { %v1169_v13 = vpack.c.bf16 %v1207_v10, %v1207_v10  ;;  %v1210_v14 = vadd.f32 %v1209_v12, %v1208_v11 }
 0x169   : > { %945 = vst [vmem:[%s1773_s20 + $0x38] sm:$0xf] %v1169_v13  ;;  %v1171_v17 = vpack.c.bf16 %v1210_v14, %v1210_v14 }
 0x16b   : > { %947 = vst [vmem:[%s1773_s20 + $0x44] sm:$0xf] %v1171_v17  ;;  %v1211_v21 = vpop.f32.mrb[12].mxu1 }
 0x16c   : > { %v1212_v23 = vpop.f32.mrb[13].mxu1 }
 0x16d   : > { %v1213_v24 = vadd.f32 %v1212_v23, %v1211_v21  ;;  %v1214_v25 = vpop.f32.mrb[14].mxu1 }
 0x16e   : > { %v1215_v26 = vpop.f32.mrb[15].mxu1 }
 0x16f   : > { %v1173_v27 = vpack.c.bf16 %v1213_v24, %v1213_v24  ;;  %v1216_v28 = vadd.f32 %v1215_v26, %v1214_v25 }
 0x170   : > { %v677_v15 = vpop.f32.mrb[0].mxu0 }
 0x171   : > { %v679_v16 = vpop.f32.mrb[1].mxu0  ;;  %949 = vst [vmem:[%s1773_s20 + $0x50] sm:$0xf] %v1173_v27  ;;  %v1175_v31 = vpack.c.bf16 %v1216_v28, %v1216_v28 }
 0x172   : > { %v1160_v18 = vpack.c.bf16 %v679_v16, %v677_v15  ;;  %v681_v19 = vpop.f32.mrb[2].mxu0 }
 0x173   : > { %v683_v20 = vpop.f32.mrb[3].mxu0  ;;  %951 = vst [vmem:[%s1773_s20 + $0x5c] sm:$0xf] %v1175_v31 }
 0x174   : > { %936 = vst [vmem:[%s1773_s20] sm:$0xff] %v1160_v18  ;;  %v1162_v22 = vpack.c.bf16 %v683_v20, %v681_v19 }
 0x176   : > { %938 = vst [vmem:[%s1773_s20 + $0xc] sm:$0xff] %v1162_v22 }
 0x178   : > { %v687_v29 = vpop.f32.mrb[4].mxu0 }
 0x179   : > { %v689_v30 = vpop.f32.mrb[5].mxu0 }
 0x17a   : > { %v1164_v32 = vpack.c.bf16 %v689_v30, %v687_v29  ;;  %v691_v33 = vpop.f32.mrb[6].mxu0 }
 0x17b   : > { %v693_v34 = vpop.f32.mrb[7].mxu0 }
 0x17c   : > { %940 = vst [vmem:[%s1773_s20 + $0x18] sm:$0xff] %v1164_v32  ;;  %v1166_v35 = vpack.c.bf16 %v693_v34, %v691_v33 }
 0x17e   : > { %942 = vst [vmem:[%s1773_s20 + $0x24] sm:$0xff] %v1166_v35 }
 0x180   : > { %v697_v36 = vpop.f32.mrb[8].mxu0 }
 0x181   : > { %v699_v37 = vpop.f32.mrb[9].mxu0 }
 0x182   : > { %v1168_v38 = vpack.c.bf16 %v699_v37, %v697_v36  ;;  %v701_v39 = vpop.f32.mrb[10].mxu0 }
 0x183   : > { %v703_v40 = vpop.f32.mrb[11].mxu0 }
 0x184   : > { %944 = vst [vmem:[%s1773_s20 + $0x30] sm:$0xff] %v1168_v38  ;;  %v1170_v41 = vpack.c.bf16 %v703_v40, %v701_v39 }
 0x186   : > { %946 = vst [vmem:[%s1773_s20 + $0x3c] sm:$0xff] %v1170_v41 }
 0x188   : > { %v707_v42 = vpop.f32.mrb[12].mxu0 }
 0x189   : > { %v709_v43 = vpop.f32.mrb[13].mxu0 }
 0x18a   : > { %v1172_v44 = vpack.c.bf16 %v709_v43, %v707_v42  ;;  %v711_v45 = vpop.f32.mrb[14].mxu0 }
 0x18b   : > { %v713_v46 = vpop.f32.mrb[15].mxu0 }
 0x18c   : > { %948 = vst [vmem:[%s1773_s20 + $0x48] sm:$0xff] %v1172_v44  ;;  %v1174_v47 = vpack.c.bf16 %v713_v46, %v711_v45 }
 0x18e   : > { %950 = vst [vmem:[%s1773_s20 + $0x54] sm:$0xff] %v1174_v47 }
 0x18f   : > { %1448 = shalt.err (!%p1445_p8)
}
 0x190   : > { %s1449_s25 = scalar_lea.hbm %s1794_s16, 1536  ;;  %s1453_s4 = scalar_lea.hbm %s1849_s2, 3072 }
 0x191   : > { %p1450_p0 = scmp.ne.s32.totalorder %s1794_s16, %s1449_s25  ;;  %p1454_p12 = scmp.lt.u32.totalorder %s1794_s16, %s1849_s2 }
 0x192   : > { %p1455_p2 = scmp.lt.u32.totalorder %s1453_s4, %s1449_s25  ;;  %p1457_p10 = scmp.lt.u32.totalorder %s1449_s25, %s1794_s16 }
 0x193   : > { %p1451_p4 = pnand %p1450_p0, %p1870_p11 }
 0x194   : > { %p1456_p9 = por %p1455_p2, %p1454_p12 }
 0x195   : > { %p1452_p6 = pneg %p1451_p4 }
 0x196   : > { %p1458_p13 = por %p1457_p10, %p1456_p9 }
 0x198   : > { %p1459_p5 = pnand %p1458_p13, %p1452_p6 }
 0x19a   : > { %1462 = shalt.err (!%p1459_p5)
}
 0x19b   : > { %s1531_s18 = smov 192   ;;  %s1532_s20 = smov 384  }
 0x19c   : > { %s1533_s23 = smov 12  }
 0x19d   : > { %1226 = dma.vmem_to_hbm [thread:$0]  (%p1870_p11), %s1796_s27, 1536, %s1794_s16, %s953_s12, %s1531_s18, %s1532_s20, %s1533_s23  }
 0x19e PF: > { %s984_s15 = sand.u32 1, %s1501_s9   ;;  %p1871_p1 = scmp.ne.s32.totalorder %s1860_s22, 0 }
 0x19f   : > { %p1872_p3 = scmp.ge.s32.totalorder %s1521_s14, 2  ;;  %s985_s26 = scalar_lea.sflag [#allocation5], %s984_s15 }
 0x1a1   : > { %p1237_p7 = pnand %p1872_p3, %p1871_p1 }
 0x1a3   : > { %1496 = dma.done.wait (!%p1237_p7), %s985_s26, 1536  }
 0x1a4   : > { %1498 = vsyncadd (!%p1237_p7), %s985_s26, 4294965760  ;;  %s19_s14 = sadd.s32 1, %s1521_s14   ;;  %s1873_s9 = smov %s1505_s10 }
 0x1a5   : > { %p16_p8 = scmp.ge.s32.totalorder %s19_s14, 4   ;;  %s1874_s10 = smov %s1509_s11 }
 0x1a6   : > { %s1875_s11 = smov %s1675_s29  ;;  %s1876_s12 = smov %s1517_s13 }
 0x1a7   : > { %s1877_s13 = smov %s1879_s28  ;;  %18 = sbr.rel (!%p16_p8) target bundleno = 7 (0x7), region = 87 }
 0x1ae   :  { %990 = vsyncpa [#allocation4], 1 }
 0x1af   :  { %992 = vsyncpa [#allocation4 + $0x1], 1 }
 0x1b0   :  { %993 = vsyncpa [#allocation7], 1 }
 0x1b1   :  { %995 = vsyncpa [#allocation7 + $0x1], 1 }
 0x1b2   :  { %996 = vsyncpa [#allocation5], 1 }
 0x1b3   :  { %998 = vsyncpa [#allocation5 + $0x1], 1 }

</bundles_post_ra>
